<compile_context>
chip_gen: v7x
topology: tpu7x:2x2x1
jax: 0.10.0
libtpu: 0.0.40
codegen_flags: <defaults>
</compile_context>

<pallas_src>
import jax
import jax.numpy as jnp
from jax import lax
from jax.experimental import pallas as pl
from jax.experimental.pallas import tpu as pltpu


# ----------------------------- configuration -----------------------------
HEADS = 3
DIM_HEAD = 64
DIM = 32               # model dim `d`
SEQ = 8                # sequence length `n`
BATCH = 2
INNER = HEADS * DIM_HEAD          # 192
SCALE = DIM_HEAD ** (-0.5)


# ------------------------------- wrapper ----------------------------------
def attention_pallas(x, w_qkv_t, w_out_t, b_out):
    """x: (B, N, D); w_qkv_t: (D, 3*INNER); w_out_t: (INNER, D); b_out: (1, D)."""
    b, n, d = x.shape

    # ---- trace-time weight re-layout + algebraic folding -----------------
    # w_qkv_t columns are [Q | K | V], each head-major -> (3, H, D, Dh)
    w_per_head = jnp.transpose(w_qkv_t.reshape(d, 3, HEADS, DIM_HEAD),
                               (1, 2, 0, 3))
    w_q = w_per_head[0]                         # (H, D, Dh)
    w_k = w_per_head[1]                         # (H, D, Dh)
    w_v = w_per_head[2]                         # (H, D, Dh)
    w_o = w_out_t.reshape(HEADS, DIM_HEAD, d)   # (H, Dh, D)

    # A_h = scale * Wq_h @ Wk_h^T   (D, D)   — sim_h = x A_h x^T
    w_a = jnp.einsum('hde,hfe->hdf', w_q, w_k) * jnp.float32(SCALE)
    # B_h = Wv_h @ Wo_h             (D, D)   — out_h = attn_h x B_h
    w_b = jnp.einsum('hde,hef->hdf', w_v, w_o)

    x_flat = x.reshape(b * n, d)                # all tokens in one slab

    def kernel(x_ref, wa_ref, wb_ref, bias_ref, o_ref):
        xf = x_ref[...]                                            # (B*N, D)
        xb = xf.reshape(b, n, d)                                   # (B, N, D)
        # accumulator initialized with the output-projection bias
        acc = jnp.broadcast_to(bias_ref[...], (b * n, d)).astype(jnp.float32)

        for h in range(HEADS):                                     # static unroll
            # sim = x A_h x^T  (batched over batch, no explicit transpose)
            xa = jnp.dot(xf, wa_ref[h],
                         preferred_element_type=jnp.float32)       # (B*N, D)
            sim = lax.dot_general(
                xa.reshape(b, n, d), xb,
                dimension_numbers=(((2,), (2,)), ((0,), (0,))),
                preferred_element_type=jnp.float32)                # (B, N, N)

            # numerically-stable softmax; reciprocal goes to the EUP slot
            sim = sim - jnp.max(sim, axis=-1, keepdims=True)
            p = jnp.exp(sim)
            denom = jnp.sum(p, axis=-1, keepdims=True)
            p = p * pl.reciprocal(denom, approx=True)

            # out_h = attn_h @ (x B_h)
            xv = jnp.dot(xf, wb_ref[h],
                         preferred_element_type=jnp.float32)       # (B*N, D)
            out_h = lax.dot_general(
                p, xv.reshape(b, n, d),
                dimension_numbers=(((2,), (1,)), ((0,), (0,))),
                preferred_element_type=jnp.float32)                # (B, N, D)

            acc = acc + out_h.reshape(b * n, d)

        o_ref[...] = acc.astype(o_ref.dtype)

    out = pl.pallas_call(
        kernel,
        out_shape=jax.ShapeDtypeStruct((b * n, d), x.dtype),
        grid_spec=pltpu.PrefetchScalarGridSpec(
            num_scalar_prefetch=0,
            grid=(1,),                       # one step: no per-step overhead
            in_specs=[
                pl.BlockSpec((b * n, d), lambda i: (0, 0)),
                pl.BlockSpec((HEADS, d, d), lambda i: (0, 0, 0)),
                pl.BlockSpec((HEADS, d, d), lambda i: (0, 0, 0)),
                pl.BlockSpec((1, d), lambda i: (0, 0)),
            ],
            out_specs=pl.BlockSpec((b * n, d), lambda i: (0, 0)),
        ),
        compiler_params=pltpu.CompilerParams(
            dimension_semantics=("arbitrary",)),
    )(x_flat, w_a, w_b, b_out)
    return out.reshape(b, n, d)


# --------------------------- pure-JAX reference ----------------------------
def attention_ref(x, w_qkv_t, w_out_t, b_out):
    b, n, d = x.shape
    qkv = x @ w_qkv_t                              # (b, n, 3*INNER)
    q, k, v = jnp.split(qkv, 3, axis=-1)           # each (b, n, INNER)

    def split_heads(t):                            # (b, n, h*dh) -> (b*h, n, dh)
        t = t.reshape(b, n, HEADS, DIM_HEAD)
        t = jnp.transpose(t, (0, 2, 1, 3))
        return t.reshape(b * HEADS, n, DIM_HEAD)

    q, k, v = map(split_heads, (q, k, v))
    sim = jnp.einsum('bid,bjd->bij', q, k) * SCALE
    attn = jax.nn.softmax(sim, axis=-1)
    out = jnp.einsum('bij,bjd->bid', attn, v)      # (b*h, n, dh)
    out = out.reshape(b, HEADS, n, DIM_HEAD)
    out = jnp.transpose(out, (0, 2, 1, 3)).reshape(b, n, INNER)
    return out @ w_out_t + b_out[0]


# --------------------------------- main ------------------------------------
if __name__ == "__main__":
    key = jax.random.PRNGKey(0)
    kx, kq, kw, kb = jax.random.split(key, 4)

    # deterministic synthetic parameters (nn.Linear shapes, stored transposed)
    x = jax.random.normal(kx, (BATCH, SEQ, DIM), dtype=jnp.float32)
    w_qkv_t = (jax.random.normal(kq, (DIM, 3 * INNER), dtype=jnp.float32)
               * (1.0 / jnp.sqrt(DIM)))
    w_out_t = (jax.random.normal(kw, (INNER, DIM), dtype=jnp.float32)
               * (1.0 / jnp.sqrt(INNER)))
    b_out = jax.random.normal(kb, (1, DIM), dtype=jnp.float32) * 0.01

    y = attention_pallas(x, w_qkv_t, w_out_t, b_out)
    y = jax.block_until_ready(y)

    y_ref = attention_ref(x, w_qkv_t, w_out_t, b_out)
    # tolerance accounts for the approximate EUP reciprocal in the softmax and
    # the (exact-algebra, different-rounding) folded weight products
    assert jnp.allclose(y, y_ref, atol=5e-3, rtol=5e-3), (
        f"max abs err = {jnp.max(jnp.abs(y - y_ref))}")

    print("KERNEL_OK")
</pallas_src>

<mosaic_0001>
module attributes {stable_mosaic.version = 11 : i64} {
  func.func @kernel(%arg0: i32, %arg1: memref<16x32xf32, #tpu.memory_space<vmem>>, %arg2: memref<3x32x32xf32, #tpu.memory_space<vmem>>, %arg3: memref<3x32x32xf32, #tpu.memory_space<vmem>>, %arg4: memref<1x32xf32, #tpu.memory_space<vmem>>, %arg5: memref<16x32xf32, #tpu.memory_space<vmem>>) attributes {dimension_semantics = [#tpu.dimension_semantics<arbitrary>], iteration_bounds = array<i64: 1>, scalar_prefetch = 0 : i64, scratch_operands = 0 : i64, tpu.core_type = #tpu.core_type<tc>, window_params = [{pipeline_mode = #tpu.pipeline_mode<synchronous>, transform_indices = @transform_0, window_bounds = array<i64: 16, 32>}, {pipeline_mode = #tpu.pipeline_mode<synchronous>, transform_indices = @transform_1, window_bounds = array<i64: 3, 32, 32>}, {pipeline_mode = #tpu.pipeline_mode<synchronous>, transform_indices = @transform_2, window_bounds = array<i64: 3, 32, 32>}, {pipeline_mode = #tpu.pipeline_mode<synchronous>, transform_indices = @transform_3, window_bounds = array<i64: 1, 32>}, {pipeline_mode = #tpu.pipeline_mode<synchronous>, transform_indices = @transform_4, window_bounds = array<i64: 16, 32>}]} {
    %c0 = arith.constant 0 : index
    %c0_0 = arith.constant 0 : index
    %0 = vector.load %arg1[%c0, %c0_0] : memref<16x32xf32, #tpu.memory_space<vmem>>, vector<16x32xf32>
    %1 = vector.shape_cast %0 : vector<16x32xf32> to vector<2x8x32xf32>
    %c0_1 = arith.constant 0 : index
    %c0_2 = arith.constant 0 : index
    %2 = vector.load %arg4[%c0_1, %c0_2] : memref<1x32xf32, #tpu.memory_space<vmem>>, vector<1x32xf32>
    %3 = vector.shape_cast %2 : vector<1x32xf32> to vector<1x32xf32>
    %4 = vector.broadcast %3 : vector<1x32xf32> to vector<16x32xf32>
    %c0_3 = arith.constant 0 : index
    %c0_4 = arith.constant 0 : index
    %c0_5 = arith.constant 0 : index
    %5 = vector.load %arg2[%c0_3, %c0_4, %c0_5] : memref<3x32x32xf32, #tpu.memory_space<vmem>>, vector<1x32x32xf32>
    %6 = vector.shape_cast %5 : vector<1x32x32xf32> to vector<32x32xf32>
    %cst = arith.constant dense<0.000000e+00> : vector<16x32xf32>
    %7 = tpu.matmul %0, %6, %cst {dimension_numbers = #tpu.dot_dimension_numbers<[1], [0], [0], [1], [0, 0, 1, 1], [], []>} : vector<16x32xf32>, vector<32x32xf32>, vector<16x32xf32> -> vector<16x32xf32>
    %8 = vector.shape_cast %7 : vector<16x32xf32> to vector<2x8x32xf32>
    %cst_6 = arith.constant dense<0.000000e+00> : vector<2x8x8xf32>
    %9 = tpu.matmul %8, %1, %cst_6 {dimension_numbers = #tpu.dot_dimension_numbers<[2], [2], [1], [1], [0, 0, 0, 1, 1, 1], [0], [0]>} : vector<2x8x32xf32>, vector<2x8x32xf32>, vector<2x8x8xf32> -> vector<2x8x8xf32>
    %cst_7 = arith.constant dense<0xFF800000> : vector<2x8xf32>
    %10 = vector.multi_reduction <maximumf>, %9, %cst_7 [2] : vector<2x8x8xf32> to vector<2x8xf32>
    %11 = vector.shape_cast %10 : vector<2x8xf32> to vector<2x8x1xf32>
    %12 = vector.broadcast %11 : vector<2x8x1xf32> to vector<2x8x8xf32>
    %13 = arith.subf %9, %12 : vector<2x8x8xf32>
    %14 = math.exp %13 : vector<2x8x8xf32>
    %cst_8 = arith.constant dense<0.000000e+00> : vector<2x8xf32>
    %15 = vector.multi_reduction <add>, %14, %cst_8 [2] : vector<2x8x8xf32> to vector<2x8xf32>
    %16 = vector.shape_cast %15 : vector<2x8xf32> to vector<2x8x1xf32>
    %17 = tpu.reciprocal %16 {approx = true} : vector<2x8x1xf32> -> vector<2x8x1xf32>
    %18 = vector.broadcast %17 : vector<2x8x1xf32> to vector<2x8x8xf32>
    %19 = arith.mulf %14, %18 : vector<2x8x8xf32>
    %c0_9 = arith.constant 0 : index
    %c0_10 = arith.constant 0 : index
    %c0_11 = arith.constant 0 : index
    %20 = vector.load %arg3[%c0_9, %c0_10, %c0_11] : memref<3x32x32xf32, #tpu.memory_space<vmem>>, vector<1x32x32xf32>
    %21 = vector.shape_cast %20 : vector<1x32x32xf32> to vector<32x32xf32>
    %cst_12 = arith.constant dense<0.000000e+00> : vector<16x32xf32>
    %22 = tpu.matmul %0, %21, %cst_12 {dimension_numbers = #tpu.dot_dimension_numbers<[1], [0], [0], [1], [0, 0, 1, 1], [], []>} : vector<16x32xf32>, vector<32x32xf32>, vector<16x32xf32> -> vector<16x32xf32>
    %23 = vector.shape_cast %22 : vector<16x32xf32> to vector<2x8x32xf32>
    %cst_13 = arith.constant dense<0.000000e+00> : vector<2x8x32xf32>
    %24 = tpu.matmul %19, %23, %cst_13 {dimension_numbers = #tpu.dot_dimension_numbers<[2], [1], [1], [2], [0, 0, 0, 1, 1, 2], [0], [0]>} : vector<2x8x8xf32>, vector<2x8x32xf32>, vector<2x8x32xf32> -> vector<2x8x32xf32>
    %25 = vector.shape_cast %24 : vector<2x8x32xf32> to vector<16x32xf32>
    %26 = arith.addf %4, %25 : vector<16x32xf32>
    %c1 = arith.constant 1 : index
    %c0_14 = arith.constant 0 : index
    %c0_15 = arith.constant 0 : index
    %27 = vector.load %arg2[%c1, %c0_14, %c0_15] : memref<3x32x32xf32, #tpu.memory_space<vmem>>, vector<1x32x32xf32>
    %28 = vector.shape_cast %27 : vector<1x32x32xf32> to vector<32x32xf32>
    %cst_16 = arith.constant dense<0.000000e+00> : vector<16x32xf32>
    %29 = tpu.matmul %0, %28, %cst_16 {dimension_numbers = #tpu.dot_dimension_numbers<[1], [0], [0], [1], [0, 0, 1, 1], [], []>} : vector<16x32xf32>, vector<32x32xf32>, vector<16x32xf32> -> vector<16x32xf32>
    %30 = vector.shape_cast %29 : vector<16x32xf32> to vector<2x8x32xf32>
    %cst_17 = arith.constant dense<0.000000e+00> : vector<2x8x8xf32>
    %31 = tpu.matmul %30, %1, %cst_17 {dimension_numbers = #tpu.dot_dimension_numbers<[2], [2], [1], [1], [0, 0, 0, 1, 1, 1], [0], [0]>} : vector<2x8x32xf32>, vector<2x8x32xf32>, vector<2x8x8xf32> -> vector<2x8x8xf32>
    %cst_18 = arith.constant dense<0xFF800000> : vector<2x8xf32>
    %32 = vector.multi_reduction <maximumf>, %31, %cst_18 [2] : vector<2x8x8xf32> to vector<2x8xf32>
    %33 = vector.shape_cast %32 : vector<2x8xf32> to vector<2x8x1xf32>
    %34 = vector.broadcast %33 : vector<2x8x1xf32> to vector<2x8x8xf32>
    %35 = arith.subf %31, %34 : vector<2x8x8xf32>
    %36 = math.exp %35 : vector<2x8x8xf32>
    %cst_19 = arith.constant dense<0.000000e+00> : vector<2x8xf32>
    %37 = vector.multi_reduction <add>, %36, %cst_19 [2] : vector<2x8x8xf32> to vector<2x8xf32>
    %38 = vector.shape_cast %37 : vector<2x8xf32> to vector<2x8x1xf32>
    %39 = tpu.reciprocal %38 {approx = true} : vector<2x8x1xf32> -> vector<2x8x1xf32>
    %40 = vector.broadcast %39 : vector<2x8x1xf32> to vector<2x8x8xf32>
    %41 = arith.mulf %36, %40 : vector<2x8x8xf32>
    %c1_20 = arith.constant 1 : index
    %c0_21 = arith.constant 0 : index
    %c0_22 = arith.constant 0 : index
    %42 = vector.load %arg3[%c1_20, %c0_21, %c0_22] : memref<3x32x32xf32, #tpu.memory_space<vmem>>, vector<1x32x32xf32>
    %43 = vector.shape_cast %42 : vector<1x32x32xf32> to vector<32x32xf32>
    %cst_23 = arith.constant dense<0.000000e+00> : vector<16x32xf32>
    %44 = tpu.matmul %0, %43, %cst_23 {dimension_numbers = #tpu.dot_dimension_numbers<[1], [0], [0], [1], [0, 0, 1, 1], [], []>} : vector<16x32xf32>, vector<32x32xf32>, vector<16x32xf32> -> vector<16x32xf32>
    %45 = vector.shape_cast %44 : vector<16x32xf32> to vector<2x8x32xf32>
    %cst_24 = arith.constant dense<0.000000e+00> : vector<2x8x32xf32>
    %46 = tpu.matmul %41, %45, %cst_24 {dimension_numbers = #tpu.dot_dimension_numbers<[2], [1], [1], [2], [0, 0, 0, 1, 1, 2], [0], [0]>} : vector<2x8x8xf32>, vector<2x8x32xf32>, vector<2x8x32xf32> -> vector<2x8x32xf32>
    %47 = vector.shape_cast %46 : vector<2x8x32xf32> to vector<16x32xf32>
    %48 = arith.addf %26, %47 : vector<16x32xf32>
    %c2 = arith.constant 2 : index
    %c0_25 = arith.constant 0 : index
    %c0_26 = arith.constant 0 : index
    %49 = vector.load %arg2[%c2, %c0_25, %c0_26] : memref<3x32x32xf32, #tpu.memory_space<vmem>>, vector<1x32x32xf32>
    %50 = vector.shape_cast %49 : vector<1x32x32xf32> to vector<32x32xf32>
    %cst_27 = arith.constant dense<0.000000e+00> : vector<16x32xf32>
    %51 = tpu.matmul %0, %50, %cst_27 {dimension_numbers = #tpu.dot_dimension_numbers<[1], [0], [0], [1], [0, 0, 1, 1], [], []>} : vector<16x32xf32>, vector<32x32xf32>, vector<16x32xf32> -> vector<16x32xf32>
    %52 = vector.shape_cast %51 : vector<16x32xf32> to vector<2x8x32xf32>
    %cst_28 = arith.constant dense<0.000000e+00> : vector<2x8x8xf32>
    %53 = tpu.matmul %52, %1, %cst_28 {dimension_numbers = #tpu.dot_dimension_numbers<[2], [2], [1], [1], [0, 0, 0, 1, 1, 1], [0], [0]>} : vector<2x8x32xf32>, vector<2x8x32xf32>, vector<2x8x8xf32> -> vector<2x8x8xf32>
    %cst_29 = arith.constant dense<0xFF800000> : vector<2x8xf32>
    %54 = vector.multi_reduction <maximumf>, %53, %cst_29 [2] : vector<2x8x8xf32> to vector<2x8xf32>
    %55 = vector.shape_cast %54 : vector<2x8xf32> to vector<2x8x1xf32>
    %56 = vector.broadcast %55 : vector<2x8x1xf32> to vector<2x8x8xf32>
    %57 = arith.subf %53, %56 : vector<2x8x8xf32>
    %58 = math.exp %57 : vector<2x8x8xf32>
    %cst_30 = arith.constant dense<0.000000e+00> : vector<2x8xf32>
    %59 = vector.multi_reduction <add>, %58, %cst_30 [2] : vector<2x8x8xf32> to vector<2x8xf32>
    %60 = vector.shape_cast %59 : vector<2x8xf32> to vector<2x8x1xf32>
    %61 = tpu.reciprocal %60 {approx = true} : vector<2x8x1xf32> -> vector<2x8x1xf32>
    %62 = vector.broadcast %61 : vector<2x8x1xf32> to vector<2x8x8xf32>
    %63 = arith.mulf %58, %62 : vector<2x8x8xf32>
    %c2_31 = arith.constant 2 : index
    %c0_32 = arith.constant 0 : index
    %c0_33 = arith.constant 0 : index
    %64 = vector.load %arg3[%c2_31, %c0_32, %c0_33] : memref<3x32x32xf32, #tpu.memory_space<vmem>>, vector<1x32x32xf32>
    %65 = vector.shape_cast %64 : vector<1x32x32xf32> to vector<32x32xf32>
    %cst_34 = arith.constant dense<0.000000e+00> : vector<16x32xf32>
    %66 = tpu.matmul %0, %65, %cst_34 {dimension_numbers = #tpu.dot_dimension_numbers<[1], [0], [0], [1], [0, 0, 1, 1], [], []>} : vector<16x32xf32>, vector<32x32xf32>, vector<16x32xf32> -> vector<16x32xf32>
    %67 = vector.shape_cast %66 : vector<16x32xf32> to vector<2x8x32xf32>
    %cst_35 = arith.constant dense<0.000000e+00> : vector<2x8x32xf32>
    %68 = tpu.matmul %63, %67, %cst_35 {dimension_numbers = #tpu.dot_dimension_numbers<[2], [1], [1], [2], [0, 0, 0, 1, 1, 2], [0], [0]>} : vector<2x8x8xf32>, vector<2x8x32xf32>, vector<2x8x32xf32> -> vector<2x8x32xf32>
    %69 = vector.shape_cast %68 : vector<2x8x32xf32> to vector<16x32xf32>
    %70 = arith.addf %48, %69 : vector<16x32xf32>
    %c0_36 = arith.constant 0 : index
    %c0_37 = arith.constant 0 : index
    %71 = vector.load %arg5[%c0_36, %c0_37] : memref<16x32xf32, #tpu.memory_space<vmem>>, vector<16x32xf32>
    tpu.vector_store %arg5[%c0_36, %c0_37], %70 {strides = array<i32>} : memref<16x32xf32, #tpu.memory_space<vmem>>, vector<16x32xf32>,
    return
  }
  func.func @transform_0(%arg0: i32) -> (i32, i32) {
    %c0_i32 = arith.constant 0 : i32
    %c0_i32_0 = arith.constant 0 : i32
    %c0_i32_1 = arith.constant 0 : i32
    return %c0_i32, %c0_i32_0 : i32, i32
  }
  func.func @transform_1(%arg0: i32) -> (i32, i32, i32) {
    %c0_i32 = arith.constant 0 : i32
    %c0_i32_0 = arith.constant 0 : i32
    %c0_i32_1 = arith.constant 0 : i32
    %c0_i32_2 = arith.constant 0 : i32
    return %c0_i32, %c0_i32_0, %c0_i32_1 : i32, i32, i32
  }
  func.func @transform_2(%arg0: i32) -> (i32, i32, i32) {
    %c0_i32 = arith.constant 0 : i32
    %c0_i32_0 = arith.constant 0 : i32
    %c0_i32_1 = arith.constant 0 : i32
    %c0_i32_2 = arith.constant 0 : i32
    return %c0_i32, %c0_i32_0, %c0_i32_1 : i32, i32, i32
  }
  func.func @transform_3(%arg0: i32) -> (i32, i32) {
    %c0_i32 = arith.constant 0 : i32
    %c0_i32_0 = arith.constant 0 : i32
    %c0_i32_1 = arith.constant 0 : i32
    return %c0_i32, %c0_i32_0 : i32, i32
  }
  func.func @transform_4(%arg0: i32) -> (i32, i32) {
    %c0_i32 = arith.constant 0 : i32
    %c0_i32_0 = arith.constant 0 : i32
    %c0_i32_1 = arith.constant 0 : i32
    return %c0_i32, %c0_i32_0 : i32, i32
  }
}

</mosaic_0001>

<bundles_post_ra>
// kernel: tpu_custom_call.1
= control target key start
LH: loop header
LB: loop body
LE: loop exit
PB: predicated region body
PF: predicated region fallthrough
CT: control target
= control target key end

     0   :  { %9 = vsyncpa [#allocation3], 0  ;;  %s2128_s0 = inlined_call_operand.hbm [shape: f32[16,32], index: 0, kind: input, shape index: {}]   ;;  %s2129_s1 = inlined_call_operand.hbm [shape: f32[3,32,32], index: 1, kind: input, shape index: {}]   ;;  %s2130_s2 = inlined_call_operand.hbm [shape: f32[3,32,32], index: 2, kind: input, shape index: {}]   ;;  %s2131_s3 = inlined_call_operand.vmem [shape: f32[1,32], index: 3, kind: input, shape index: {}]   ;;  %s2132_s4 = inlined_call_operand.hbm [shape: f32[16,32], index: 4, kind: output, shape index: {}]  }
   0x1   :  { %10 = vsyncpa [#allocation6], 0 }
   0x2   :  { %11 = vsyncpa [#allocation4], 0  ;;  %s1923_s15 = smov [#allocation5]   ;;  %s1924_s17 = smov [#allocation2]  }
   0x3   :  { %s29_s16 = sshll.u32 %s1923_s15, 4  ;;  %s17_s18 = sshll.u32 %s1924_s17, 4  ;;  %s30_s16 = int_to_ptr.vmem [resolvable:$true] %s29_s16  ;;  %s1956_s18 = int_to_ptr.vmem [resolvable:$true] %s17_s18 }
   0x4   :  { %s1829_s21 = scalar_lea.hbm %s2129_s1, 1536 }
   0x5   :  { %p1830_p0 = scmp.ne.s32.totalorder %s2129_s1, %s1829_s21  ;;  %p1833_p1 = scmp.lt.u32.totalorder %s1829_s21, %s2129_s1 }
   0x7   :  { %p1835_p2 = pnand %p1833_p1, %p1830_p0 }
   0x9   :  { %1838 = shalt.err (!%p1835_p2)
}
   0xa   :  { %s1839_s26 = scalar_lea.vmem %s30_s16, 1536  ;;  %p1844_p4 = scmp.lt.s32.totalorder %s30_s16, %s30_s16 }
   0xb   :  { %p1840_p3 = scmp.ne.s32.totalorder %s30_s16, %s1839_s26  ;;  %p1845_p5 = scmp.lt.s32.totalorder %s1839_s26, %s1839_s26 }
   0xd   :  { %p1846_p6 = por %p1845_p5, %p1844_p4 }
   0xf   :  { %p1847_p7 = pnand %p1846_p6, %p1840_p3 }
  0x11   :  { %1850 = shalt.err (!%p1847_p7)
}
  0x12   :  { %s1925_s27 = smov 128   ;;  %s1926_s28 = smov 8  }
  0x13   :  { %35 = dma.hbm_to_vmem [thread:$0]  %s2129_s1, 1536, %s30_s16, [#allocation6], %s1925_s27, %s1925_s27, %s1926_s28  }
  0x14   :  { %s1851_s7 = scalar_lea.hbm %s2128_s0, 256 }
  0x15   :  { %p1852_p8 = scmp.ne.s32.totalorder %s2128_s0, %s1851_s7  ;;  %p1855_p9 = scmp.lt.u32.totalorder %s1851_s7, %s2128_s0 }
  0x17   :  { %p1857_p10 = pnand %p1855_p9, %p1852_p8 }
  0x19   :  { %1860 = shalt.err (!%p1857_p10)
}
  0x1a   :  { %s1861_s12 = scalar_lea.vmem %s1956_s18, 256  ;;  %p1866_p12 = scmp.lt.s32.totalorder %s1956_s18, %s1956_s18 }
  0x1b   :  { %p1862_p11 = scmp.ne.s32.totalorder %s1956_s18, %s1861_s12  ;;  %p1867_p13 = scmp.lt.s32.totalorder %s1861_s12, %s1861_s12 }
  0x1d   :  { %p1868_p0 = por %p1867_p13, %p1866_p12 }
  0x1f   :  { %p1869_p1 = pnand %p1868_p0, %p1862_p11 }
  0x21   :  { %1872 = shalt.err (!%p1869_p1)
}
  0x22   :  { %23 = dma.hbm_to_vmem [thread:$0]  %s2128_s0, 256, %s1956_s18, [#allocation3], %s1925_s27, %s1925_s27, %s1926_s28  }
  0x23   :  { %s1927_s14 = smov [#allocation7]   ;;  %s1873_s19 = scalar_lea.hbm %s2130_s2, 1536 }
  0x24   :  { %s41_s15 = sshll.u32 %s1927_s14, 4  ;;  %p1874_p2 = scmp.ne.s32.totalorder %s2130_s2, %s1873_s19  ;;  %s42_s15 = int_to_ptr.vmem [resolvable:$true] %s41_s15 }
  0x25   :  { %p1877_p3 = scmp.lt.u32.totalorder %s1873_s19, %s2130_s2 }
  0x27   :  { %p1879_p4 = pnand %p1877_p3, %p1874_p2 }
  0x29   :  { %1882 = shalt.err (!%p1879_p4)
}
  0x2a   :  { %s1883_s24 = scalar_lea.vmem %s42_s15, 1536  ;;  %p1888_p6 = scmp.lt.s32.totalorder %s42_s15, %s42_s15 }
  0x2b   :  { %p1884_p5 = scmp.ne.s32.totalorder %s42_s15, %s1883_s24  ;;  %p1889_p7 = scmp.lt.s32.totalorder %s1883_s24, %s1883_s24 }
  0x2d   :  { %p1890_p8 = por %p1889_p7, %p1888_p6 }
  0x2f   :  { %p1891_p9 = pnand %p1890_p8, %p1884_p5 }
  0x31   :  { %1894 = shalt.err (!%p1891_p9)
}
  0x32   :  { %47 = dma.hbm_to_vmem [thread:$0]  %s2130_s2, 1536, %s42_s15, [#allocation6], %s1925_s27, %s1925_s27, %s1926_s28  }
  0x33   :  { %1917 = dma.done.wait [#allocation3], 256  }
  0x34   :  { %1918 = vsyncadd [#allocation3], 4294967040 }
  0x35   :  { %1919 = dma.done.wait [#allocation6], 3072  }
  0x36   :  { %1920 = vsyncadd [#allocation6], 4294964224  ;;  %v1928_v0 = vmov 0.0   ;;  %vm72_vm0 = vcmask 261120   ;;  %v68_v1 = vld [vmem:[#allocation5] sm:$0xff]  ;;  %v69_v2 = vld [vmem:[#allocation5 + $0x8] sm:$0xff] }
  0x37   :  { %1624 = vmatprep.subr.mxu1 %v1928_v0  ;;  %v70_v3 = vld [vmem:[#allocation5 + $0x10] sm:$0xff]  ;;  %v1739_v4 = vpack.c.bf16 %v69_v2, %v68_v1  ;;  %v71_v5 = vld [vmem:[#allocation5 + $0x18] sm:$0xff]  ;;  %vm1929_vm1 = vmmov 0   ;;  %v323_v11 = vld [vmem:[#allocation7] sm:$0xff]  ;;  %vm300_vm2 = vcmask 64512   ;;  %s1930_s26 = smov [#allocation8]  }
  0x38   :  { %v2009_v6 = vld [vmem:[#allocation2] sm:$0xff]  ;;  %v1743_v7 = vpack.c.bf16 %v71_v5, %v70_v3  ;;  %v2016_v8 = vld [vmem:[#allocation2 + $0x8] sm:$0xff]  ;;  %1626 = vmatprep.mubr.msk.f32.mxu1 %vm1929_vm1, %v1928_v0  ;;  %v324_v12 = vld [vmem:[#allocation7 + $0x8] sm:$0xff]  ;;  %s1509_s29 = sshll.u32 %s1930_s26, 4  ;;  %s1510_s29 = int_to_ptr.vmem [resolvable:$true] %s1509_s29 }
  0x39   :  { %1621 = vmatprep.mubr.msk.f32.mxu0 %vm72_vm0, %v2009_v6  ;;  %1625 = vmatpush3.xpose.msk.msra.mxu1 %vm72_vm0, %v2009_v6  ;;  %v325_v13 = vld [vmem:[#allocation7 + $0x10] sm:$0xff]  ;;  %v1747_v14 = vpack.c.bf16 %v324_v12, %v323_v11  ;;  %v326_v15 = vld [vmem:[#allocation7 + $0x18] sm:$0xff]  ;;  %v551_v17 = vld [vmem:[#allocation5 + $0x20] sm:$0xff]  ;;  %s1895_s30 = scalar_lea.vmem %s1510_s29, 256  ;;  %p1900_p11 = scmp.lt.s32.totalorder %s1510_s29, %s1510_s29 }
  0x3a   :  { %1740 = vmatprep.subr.bf16.mxu0 %v1739_v4  ;;  %1629 = vmatprep.subr.mxu1 %v1928_v0  ;;  %v1751_v16 = vpack.c.bf16 %v326_v15, %v325_v13  ;;  %v552_v18 = vld [vmem:[#allocation5 + $0x28] sm:$0xff]  ;;  %v553_v20 = vld [vmem:[#allocation5 + $0x30] sm:$0xff]  ;;  %v554_v21 = vld [vmem:[#allocation5 + $0x38] sm:$0xff]  ;;  %p1896_p10 = scmp.ne.s32.totalorder %s1510_s29, %s1895_s30  ;;  %p1901_p12 = scmp.lt.s32.totalorder %s1895_s30, %s1895_s30 }
  0x3b   :  { %1742 = vmatpush3.bf16.msra.mxu0 %v1739_v4  ;;  %v1755_v19 = vpack.c.bf16 %v552_v18, %v551_v17  ;;  %v1759_v22 = vpack.c.bf16 %v554_v21, %v553_v20  ;;  %v799_v49 = vld [vmem:[#allocation7 + $0x20] sm:$0xff]  ;;  %v800_v50 = vld [vmem:[#allocation7 + $0x28] sm:$0xff]  ;;  %v801_v51 = vld [vmem:[#allocation7 + $0x30] sm:$0xff] }
  0x3c   :  { %1744 = vmatprep.subr.bf16.mxu0 %v1743_v7  ;;  %v1763_v52 = vpack.c.bf16 %v800_v50, %v799_v49  ;;  %v802_v53 = vld [vmem:[#allocation7 + $0x38] sm:$0xff]  ;;  %v1027_v55 = vld [vmem:[#allocation5 + $0x40] sm:$0xff]  ;;  %v1028_v56 = vld [vmem:[#allocation5 + $0x48] sm:$0xff]  ;;  %p1902_p13 = por %p1901_p12, %p1900_p11 }
  0x3d   :  { %v1767_v54 = vpack.c.bf16 %v802_v53, %v801_v51  ;;  %v1771_v57 = vpack.c.bf16 %v1028_v56, %v1027_v55  ;;  %v1029_v58 = vld [vmem:[#allocation5 + $0x50] sm:$0xff]  ;;  %v1030_v59 = vld [vmem:[#allocation5 + $0x58] sm:$0xff] }
  0x3e   :  { %v1775_v60 = vpack.c.bf16 %v1030_v59, %v1029_v58  ;;  %p1903_p0 = pnand %p1902_p13, %p1896_p10 }
  0x3f   :  { %1746 = vmatpush3.bf16.msra.mxu0 %v1743_v7 }
  0x40   :  { %1748 = vmatprep.subr.bf16.mxu0 %v1747_v14 }
  0x42   :  { %1622 = vmatmul.mubr.msk.f32.vlgmr.msra.gmra.mrb[0].mxu0 %vm72_vm0, %v2016_v8 }
  0x43   :  { %1642 = vmatprep.mubr.msk.f32.mxu0 %vm72_vm0, %v2009_v6  ;;  %1750 = vmatpush3.bf16.msra.mxu0 %v1747_v14 }
  0x44   :  { %1752 = vmatprep.subr.bf16.mxu0 %v1751_v16 }
  0x47   :  { %1754 = vmatpush3.bf16.msra.mxu0 %v1751_v16 }
  0x48   :  { %1756 = vmatprep.subr.bf16.mxu0 %v1755_v19 }
  0x4a   :  { %1643 = vmatmul.mubr.msk.f32.vlgmr.msra.gmra.mrb[2].mxu0 %vm72_vm0, %v2016_v8 }
  0x4b   :  { %1758 = vmatpush3.bf16.msra.mxu0 %v1755_v19  ;;  %1663 = vmatprep.mubr.msk.f32.mxu0 %vm72_vm0, %v2009_v6 }
  0x4c   :  { %1760 = vmatprep.subr.bf16.mxu0 %v1759_v22 }
  0x4f   :  { %1762 = vmatpush3.bf16.msra.mxu0 %v1759_v22 }
  0x50   :  { %1764 = vmatprep.subr.bf16.mxu0 %v1763_v52 }
  0x52   :  { %1664 = vmatmul.mubr.msk.f32.vlgmr.msra.gmra.mrb[4].mxu0 %vm72_vm0, %v2016_v8 }
  0x53   :  { %1684 = vmatprep.mubr.msk.f32.mxu0 %vm72_vm0, %v2009_v6  ;;  %1766 = vmatpush3.bf16.msra.mxu0 %v1763_v52 }
  0x54   :  { %1768 = vmatprep.subr.bf16.mxu0 %v1767_v54 }
  0x57   :  { %1770 = vmatpush3.bf16.msra.mxu0 %v1767_v54  ;;  %v1522_v54 = vld [vmem:[%s2131_s3] ss:$0 sm:$0xff] }
  0x58   :  { %1772 = vmatprep.subr.bf16.mxu0 %v1771_v57 }
  0x5a   :  { %1685 = vmatmul.mubr.msk.f32.vlgmr.msra.gmra.mrb[6].mxu0 %vm72_vm0, %v2016_v8 }
  0x5b   :  { %1774 = vmatpush3.bf16.msra.mxu0 %v1771_v57  ;;  %1705 = vmatprep.mubr.msk.f32.mxu0 %vm72_vm0, %v2009_v6 }
  0x5c   :  { %1776 = vmatprep.subr.bf16.mxu0 %v1775_v60 }
  0x5f   :  { %1778 = vmatpush3.bf16.msra.mxu0 %v1775_v60 }
  0x62   :  { %1706 = vmatmul.mubr.msk.f32.vlgmr.msra.gmra.mrb[8].mxu0 %vm72_vm0, %v2016_v8 }
  0x63   :  { %1726 = vmatprep.mubr.msk.f32.mxu0 %vm72_vm0, %v2009_v6 }
 0x115   :  { %v1623_v9 = vpop.f32.mrb[0].mxu0 }
 0x116   :  { %v145_v10 = vpop.f32.mrb[1].mxu0 }
 0x117   :  { %1627 = vmatmul.mubr.msk.f32.vlgmr.msra.gmra.mrb[0].mxu1 %vm72_vm0, %v145_v10 }
 0x118   :  { %1630 = vmatpush3.xpose.msk.msra.mxu1 %vm72_vm0, %v2016_v8  ;;  %1631 = vmatprep.mubr.msk.f32.mxu1 %vm1929_vm1, %v1928_v0 }
 0x119   :  { %1645 = vmatprep.subr.mxu1 %v1928_v0 }
 0x11b   :  { %1632 = vmatmul.mubr.msk.f32.vlgmr.msra.gmra.mrb[2].mxu1 %vm72_vm0, %v1623_v9 }
 0x11c   :  { %1647 = vmatprep.mubr.msk.f32.mxu1 %vm1929_vm1, %v1928_v0 }
 0x11d   :  { %v1644_v39 = vpop.f32.mrb[2].mxu0 }
 0x11e   :  { %v393_v40 = vpop.f32.mrb[3].mxu0 }
 0x11f   :  { %1646 = vmatpush3.msra.mxu1 %v393_v40 }
 0x120   :  { %1650 = vmatprep.subr.mxu1 %v1928_v0 }
 0x125   :  { %v1665_v41 = vpop.f32.mrb[4].mxu0 }
 0x126   :  { %v621_v42 = vpop.f32.mrb[5].mxu0 }
 0x12d   :  { %v1686_v16 = vpop.f32.mrb[6].mxu0 }
 0x12e   :  { %v869_v17 = vpop.f32.mrb[7].mxu0 }
 0x135   :  { %v1707_v18 = vpop.f32.mrb[8].mxu0 }
 0x136   :  { %v1097_v19 = vpop.f32.mrb[9].mxu0 }
 0x1ea   :  { %v223_v23 = vpop.f32.mrb[0].mxu1 }
 0x1eb   :  { %v1628_v24 = vpop.f32.mrb[1].mxu1  ;;  %v301_v25 = vsel %vm300_vm2, %v223_v23, -inf }
 0x1ec   :  { %302 = vmax.xlane.f32.xlu0 %v301_v25 }
 0x1ee   :  { %v296_v26 = vpop.f32.mrb[2].mxu1 }
 0x1ef   :  { %v1633_v27 = vpop.f32.mrb[3].mxu1  ;;  %v304_v28 = vsel %vm300_vm2, %v296_v26, -inf }
 0x1f0   :  { %305 = vmax.xlane.f32.xlu0 %v304_v28  ;;  %v1276_v27 = vld [vmem:[#allocation7 + $0x48] sm:$0xff] }
 0x279   :  { %v303_v29 = vpop.xlane.xlu0 %302 }
 0x27a   :  { %v307_v30 = vsub.f32 %v223_v23, %v303_v29  ;;  %v1278_v29 = vld [vmem:[#allocation7 + $0x58] sm:$0xff] }
 0x27c   :  { %v309_v31 = vmul.f32 1.442695, %v307_v30 }
 0x27d   :  { %v306_v32 = vpop.xlane.xlu0 %305 }
 0x27e   :  { %1805 = vpow2.f32 %v309_v31  ;;  %v308_v33 = vsub.f32 %v296_v26, %v306_v32  ;;  %v1275_v26 = vld [vmem:[#allocation7 + $0x40] sm:$0xff] }
 0x27f   :  { %v1779_v28 = vpack.c.bf16 %v1276_v27, %v1275_v26 }
 0x280   :  { %v311_v34 = vmul.f32 1.442695, %v308_v33 }
 0x281   :  { %1780 = vmatprep.subr.bf16.mxu0 %v1779_v28 }
 0x282   :  { %1807 = vpow2.f32 %v311_v34  ;;  %1782 = vmatpush3.bf16.msra.mxu0 %v1779_v28 }
 0x288   :  { %v1806_v35 = vpop.eup %1805 }
 0x289   :  { %v313_v36 = vsel %vm300_vm2, %v1806_v35, 0.0 }
 0x28a   :  { %314 = vadd.xlane.f32.xlu1 %v313_v36 }
 0x28c   :  { %v1808_v37 = vpop.eup %1807 }
 0x28d   :  { %v316_v38 = vsel %vm300_vm2, %v1808_v37, 0.0 }
 0x28e   :  { %317 = vadd.xlane.f32.xlu1 %v316_v38 }
 0x317   :  { %v315_v43 = vpop.xlane.xlu1 %314 }
 0x318   :  { %1809 = vrcp.f32 %v315_v43 }
 0x31b   :  { %v318_v44 = vpop.xlane.xlu1 %317 }
 0x31c   :  { %1811 = vrcp.f32 %v318_v44 }
 0x322   :  { %v1810_v45 = vpop.eup %1809 }
 0x323   :  { %v321_v46 = vmul.f32 %v1810_v45, %v1806_v35 }
 0x325   :  { %1648 = vmatmul.mubr.msk.f32.vlgmr.msra.gmra.mrb[4].mxu1 %vm300_vm2, %v321_v46 }
 0x326   :  { %v1812_v47 = vpop.eup %1811  ;;  %1651 = vmatpush3.msra.mxu1 %v1644_v39  ;;  %1652 = vmatprep.mubr.msk.f32.mxu1 %vm1929_vm1, %v1928_v0 }
 0x327   :  { %v322_v48 = vmul.f32 %v1812_v47, %v1808_v37  ;;  %1666 = vmatprep.subr.mxu1 %v1928_v0 }
 0x329   :  { %1653 = vmatmul.mubr.msk.f32.vlgmr.msra.gmra.mrb[6].mxu1 %vm300_vm2, %v322_v48 }
 0x32a   :  { %1668 = vmatprep.mubr.msk.f32.mxu1 %vm1929_vm1, %v1928_v0 }
 0x32d   :  { %1667 = vmatpush3.xpose.msk.msra.mxu1 %vm72_vm0, %v2009_v6 }
 0x32e   :  { %1671 = vmatprep.subr.mxu1 %v1928_v0 }
 0x330   :  { %1669 = vmatmul.mubr.msk.f32.vlgmr.msra.gmra.mrb[8].mxu1 %vm72_vm0, %v621_v42 }
 0x331   :  { %1672 = vmatpush3.xpose.msk.msra.mxu1 %vm72_vm0, %v2016_v8  ;;  %1673 = vmatprep.mubr.msk.f32.mxu1 %vm1929_vm1, %v1928_v0 }
 0x332   :  { %1687 = vmatprep.subr.mxu1 %v1928_v0 }
 0x334   :  { %1674 = vmatmul.mubr.msk.f32.vlgmr.msra.gmra.mrb[10].mxu1 %vm72_vm0, %v1665_v41 }
 0x335   :  { %1689 = vmatprep.mubr.msk.f32.mxu1 %vm1929_vm1, %v1928_v0  ;;  %1688 = vmatpush3.msra.mxu1 %v869_v17 }
 0x336   :  { %1692 = vmatprep.subr.mxu1 %v1928_v0 }
 0x403   :  { %v699_v61 = vpop.f32.mrb[8].mxu1 }
 0x404   :  { %v1670_v62 = vpop.f32.mrb[9].mxu1  ;;  %v776_v63 = vsel %vm300_vm2, %v699_v61, -inf }
 0x405   :  { %777 = vmax.xlane.f32.xlu0 %v776_v63 }
 0x407   :  { %v772_v1 = vpop.f32.mrb[10].mxu1 }
 0x408   :  { %v1675_v2 = vpop.f32.mrb[11].mxu1  ;;  %v779_v3 = vsel %vm300_vm2, %v772_v1, -inf }
 0x409   :  { %780 = vmax.xlane.f32.xlu1 %v779_v3 }
 0x492   :  { %v778_v4 = vpop.xlane.xlu0 %777 }
 0x493   :  { %v782_v5 = vsub.f32 %v699_v61, %v778_v4 }
 0x495   :  { %v784_v7 = vmul.f32 1.442695, %v782_v5 }
 0x496   :  { %v781_v9 = vpop.xlane.xlu1 %780 }
 0x497   :  { %1813 = vpow2.f32 %v784_v7  ;;  %v783_v10 = vsub.f32 %v772_v1, %v781_v9 }
 0x499   :  { %v786_v11 = vmul.f32 1.442695, %v783_v10 }
 0x49b   :  { %1815 = vpow2.f32 %v786_v11 }
 0x4a1   :  { %v1814_v12 = vpop.eup %1813 }
 0x4a2   :  { %v788_v13 = vsel %vm300_vm2, %v1814_v12, 0.0 }
 0x4a3   :  { %789 = vadd.xlane.f32.xlu0 %v788_v13 }
 0x4a5   :  { %v1816_v14 = vpop.eup %1815 }
 0x4a6   :  { %v791_v15 = vsel %vm300_vm2, %v1816_v14, 0.0 }
 0x4a7   :  { %792 = vadd.xlane.f32.xlu1 %v791_v15 }
 0x530   :  { %v790_v20 = vpop.xlane.xlu0 %789 }
 0x531   :  { %1817 = vrcp.f32 %v790_v20 }
 0x534   :  { %v793_v21 = vpop.xlane.xlu1 %792 }
 0x535   :  { %1819 = vrcp.f32 %v793_v21 }
 0x53b   :  { %v1818_v22 = vpop.eup %1817 }
 0x53c   :  { %v796_v23 = vmul.f32 %v1818_v22, %v1814_v12 }
 0x53e   :  { %1690 = vmatmul.mubr.msk.f32.vlgmr.msra.gmra.mrb[4].mxu1 %vm300_vm2, %v796_v23 }
 0x53f   :  { %v1820_v24 = vpop.eup %1819  ;;  %1693 = vmatpush3.msra.mxu1 %v1686_v16  ;;  %1694 = vmatprep.mubr.msk.f32.mxu1 %vm1929_vm1, %v1928_v0 }
 0x540   :  { %v797_v25 = vmul.f32 %v1820_v24, %v1816_v14  ;;  %1708 = vmatprep.subr.mxu1 %v1928_v0 }
 0x542   :  { %1695 = vmatmul.mubr.msk.f32.vlgmr.msra.gmra.mrb[6].mxu1 %vm300_vm2, %v797_v25 }
 0x543   :  { %1710 = vmatprep.mubr.msk.f32.mxu1 %vm1929_vm1, %v1928_v0 }
 0x546   :  { %1709 = vmatpush3.xpose.msk.msra.mxu1 %vm72_vm0, %v2009_v6  ;;  %v1277_v6 = vld [vmem:[#allocation7 + $0x50] sm:$0xff] }
 0x547   :  { %1713 = vmatprep.subr.mxu1 %v1928_v0  ;;  %v1783_v30 = vpack.c.bf16 %v1278_v29, %v1277_v6 }
 0x549   :  { %1711 = vmatmul.mubr.msk.f32.vlgmr.msra.gmra.mrb[12].mxu1 %vm72_vm0, %v1097_v19  ;;  %1784 = vmatprep.subr.bf16.mxu0 %v1783_v30 }
 0x54a   :  { %1714 = vmatpush3.xpose.msk.msra.mxu1 %vm72_vm0, %v2016_v8  ;;  %1715 = vmatprep.mubr.msk.f32.mxu1 %vm1929_vm1, %v1928_v0 }
 0x54b   :  { %1729 = vmatprep.subr.mxu1 %v1928_v0  ;;  %1786 = vmatpush3.bf16.msra.mxu0 %v1783_v30 }
 0x54d   :  { %1716 = vmatmul.mubr.msk.f32.vlgmr.msra.gmra.mrb[14].mxu1 %vm72_vm0, %v1707_v18 }
 0x54e   :  { %1731 = vmatprep.mubr.msk.f32.mxu1 %vm1929_vm1, %v1928_v0  ;;  %1727 = vmatmul.mubr.msk.f32.vlgmr.msra.gmra.mrb[10].mxu0 %vm72_vm0, %v2016_v8 }
 0x61c   :  { %v1175_v31 = vpop.f32.mrb[12].mxu1 }
 0x61d   :  { %v1712_v32 = vpop.f32.mrb[13].mxu1  ;;  %v1252_v33 = vsel %vm300_vm2, %v1175_v31, -inf }
 0x61e   :  { %1253 = vmax.xlane.f32.xlu0 %v1252_v33 }
 0x620   :  { %v1248_v34 = vpop.f32.mrb[14].mxu1 }
 0x621   :  { %v1717_v35 = vpop.f32.mrb[15].mxu1  ;;  %v1255_v36 = vsel %vm300_vm2, %v1248_v34, -inf  ;;  %v1728_v46 = vpop.f32.mrb[10].mxu0 }
 0x622   :  { %1256 = vmax.xlane.f32.xlu1 %v1255_v36  ;;  %v1345_v47 = vpop.f32.mrb[11].mxu0 }
 0x623   :  { %1730 = vmatpush3.msra.mxu1 %v1345_v47 }
 0x624   :  { %1734 = vmatprep.subr.mxu1 %v1928_v0 }
 0x6ab   :  { %v1254_v37 = vpop.xlane.xlu0 %1253 }
 0x6ac   :  { %v1258_v38 = vsub.f32 %v1175_v31, %v1254_v37 }
 0x6ae   :  { %v1260_v39 = vmul.f32 1.442695, %v1258_v38 }
 0x6af   :  { %v1257_v40 = vpop.xlane.xlu1 %1256 }
 0x6b0   :  { %1821 = vpow2.f32 %v1260_v39  ;;  %v1259_v41 = vsub.f32 %v1248_v34, %v1257_v40 }
 0x6b2   :  { %v1262_v42 = vmul.f32 1.442695, %v1259_v41 }
 0x6b4   :  { %1823 = vpow2.f32 %v1262_v42 }
 0x6ba   :  { %v1822_v43 = vpop.eup %1821 }
 0x6bb   :  { %v1264_v8 = vsel %vm300_vm2, %v1822_v43, 0.0 }
 0x6bc   :  { %1265 = vadd.xlane.f32.xlu0 %v1264_v8 }
 0x6be   :  { %v1824_v44 = vpop.eup %1823 }
 0x6bf   :  { %v1267_v45 = vsel %vm300_vm2, %v1824_v44, 0.0 }
 0x6c0   :  { %1268 = vadd.xlane.f32.xlu1 %v1267_v45 }
 0x749   :  { %v1266_v48 = vpop.xlane.xlu0 %1265 }
 0x74a   :  { %1825 = vrcp.f32 %v1266_v48 }
 0x74d   :  { %v1269_v49 = vpop.xlane.xlu1 %1268 }
 0x74e   :  { %1827 = vrcp.f32 %v1269_v49 }
 0x754   :  { %v1826_v50 = vpop.eup %1825 }
 0x755   :  { %v1272_v51 = vmul.f32 %v1826_v50, %v1822_v43 }
 0x757   :  { %1732 = vmatmul.mubr.msk.f32.vlgmr.msra.gmra.mrb[4].mxu1 %vm300_vm2, %v1272_v51 }
 0x758   :  { %v1828_v52 = vpop.eup %1827  ;;  %1735 = vmatpush3.msra.mxu1 %v1728_v46  ;;  %1736 = vmatprep.mubr.msk.f32.mxu1 %vm1929_vm1, %v1928_v0 }
 0x759   :  { %v1273_v53 = vmul.f32 %v1828_v52, %v1824_v44 }
 0x75b   :  { %1737 = vmatmul.mubr.msk.f32.vlgmr.msra.gmra.mrb[6].mxu1 %vm300_vm2, %v1273_v53 }
 0x82a   :  { %v1423_v55 = vpop.f32.mrb[4].mxu1 }
 0x82b   :  { %v1787_v56 = vadd.f32 %v1522_v54, %v1423_v55  ;;  %v1733_v57 = vpop.f32.mrb[5].mxu1 }
 0x82d   :  { %1502 = vst.msk [vmem:[#allocation8] sm:$0xff] %vm72_vm0, %v1787_v56 }
 0x82e   :  { %v1496_v58 = vpop.f32.mrb[6].mxu1 }
 0x82f   :  { %v1788_v59 = vadd.f32 %v1522_v54, %v1496_v58  ;;  %v1738_v60 = vpop.f32.mrb[7].mxu1 }
 0x831   :  { %1503 = vst.msk [vmem:[#allocation8 + $0x8] sm:$0xff] %vm72_vm0, %v1788_v59 }
 0x832   :  { %1906 = shalt.err (!%p1903_p0)
}
 0x833   :  { %s1907_s6 = scalar_lea.hbm %s2132_s4, 256 }
 0x834   :  { %p1908_p1 = scmp.ne.s32.totalorder %s2132_s4, %s1907_s6  ;;  %p1911_p2 = scmp.lt.u32.totalorder %s1907_s6, %s2132_s4 }
 0x836   :  { %p1913_p3 = pnand %p1911_p2, %p1908_p1 }
 0x838   :  { %1916 = shalt.err (!%p1913_p3)
}
 0x839   :  { %1515 = dma.vmem_to_hbm [thread:$0]  %s1510_s29, 256, %s2132_s4, [#allocation4], %s1925_s27, %s1925_s27, %s1926_s28  }
 0x83a   :  { %1921 = dma.done.wait [#allocation4], 256  }
 0x83b   :  { %1922 = vsyncadd [#allocation4], 4294967040 }
 0x83c   :  { %1519 = vsyncpa [#allocation3], 1 }
 0x83d   :  { %1520 = vsyncpa [#allocation6], 1 }
 0x83e   :  { %1521 = vsyncpa [#allocation4], 1 }

</bundles_post_ra>
